<compile_context>
chip_gen: v6e
topology: v6e:2x2x1
jax: 0.10.0
libtpu: 0.0.40
codegen_flags: <defaults>
</compile_context>

<pallas_src>
import functools

import jax
import jax.numpy as jnp
from jax import lax
from jax.experimental import pallas as pl
from jax.experimental.pallas import tpu as pltpu


def _round_up(x, m):
    return ((x + m - 1) // m) * m


def _gmf_kernel(tile_rows, unroll, resident,
                uidx_ref, iidx_ref,      # scalar prefetch: (B_pad,) int32 in SMEM
                utab_ref, itab_ref,      # tables: VMEM blocks (resident) or HBM (pl.ANY)
                w_ref,                   # (1, D) linear weight row, VMEM-resident
                b_ref,                   # (1, 1) bias, SMEM
                o_ref,                   # (tile_rows, 1) output block, VMEM
                *scratch):
    base = pl.program_id(0) * tile_rows
    n_groups = tile_rows // unroll       # tile_rows is a multiple of `unroll`

    if resident:
        ubuf, ibuf = scratch
        # --- In-VMEM gather: no DMA descriptors at all -------------------
        # Tables are resident VMEM blocks; each row is a dynamic-index vector
        # load + store.  Unrolled by `unroll` for scheduler visibility.
        def gather_group(g, carry):
            r0 = g * unroll
            for j in range(unroll):
                r = r0 + j
                u_row = uidx_ref[base + r]
                i_row = iidx_ref[base + r]
                ubuf[pl.ds(r, 1), :] = utab_ref[pl.ds(u_row, 1), :]
                ibuf[pl.ds(r, 1), :] = itab_ref[pl.ds(i_row, 1), :]
            return carry
        lax.fori_loop(0, n_groups, gather_group, 0)
    else:
        ubuf, ibuf, sem = scratch
        # --- HBM gather: per-row async DMAs, issue loop unrolled ----------
        def issue_group(g, carry):
            r0 = g * unroll
            for j in range(unroll):
                r = r0 + j
                u_row = uidx_ref[base + r]
                i_row = iidx_ref[base + r]
                pltpu.make_async_copy(utab_ref.at[u_row], ubuf.at[r],
                                      sem.at[0]).start()
                pltpu.make_async_copy(itab_ref.at[i_row], ibuf.at[r],
                                      sem.at[1]).start()
            return carry
        lax.fori_loop(0, n_groups, issue_group, 0)
        # One aggregate wait per table.  DMA semaphores count bytes: the dummy
        # descriptor below spans the whole (tile_rows, D) scratch buffer, i.e.
        # exactly tile_rows * row_bytes, matching the tile_rows per-row copies
        # issued above (same dtype, same row width).  Keep these in sync.
        pltpu.make_async_copy(ubuf, ubuf, sem.at[0]).wait()
        pltpu.make_async_copy(ibuf, ibuf, sem.at[1]).wait()

    # --- GMF interaction + projection + sigmoid ---------------------------
    # Elementwise product on the VPU; the D-wide reduction rides the XLU.
    # No MXU matvec for an output width of 1.
    prod = ubuf[...].astype(jnp.float32) * ibuf[...].astype(jnp.float32)
    w_row = w_ref[...].astype(jnp.float32)                  # (1, D) broadcast
    logit = jnp.sum(prod * w_row, axis=-1, keepdims=True) + b_ref[0, 0]
    o_ref[...] = jax.nn.sigmoid(logit)


def gmf_forward(user_emb_table, item_emb_table, w, b, user_input, item_input,
                *, tile_rows=2048, table_dtype=None, force_gather_path=False):
    """Full GMF forward.

    user_emb_table: (num_users, D), item_emb_table: (num_items, D)
    w: (1, D) linear weight (PyTorch layout), b: (1,) bias
    user_input / item_input: (B,) int indices
    table_dtype: optional cast for the embedding tables (e.g. jnp.bfloat16 to
        halve HBM gather traffic); compute stays in f32.
    Returns: (B, 1) float32 sigmoid outputs.
    """
    utab = jnp.asarray(user_emb_table)
    itab = jnp.asarray(item_emb_table)
    if table_dtype is not None:
        utab = utab.astype(table_dtype)
        itab = itab.astype(table_dtype)

    num_users, D = utab.shape
    num_items, D2 = itab.shape
    assert D == D2
    B = int(user_input.shape[0])

    itemsize = jnp.dtype(utab.dtype).itemsize
    table_bytes = (num_users + num_items) * D * itemsize
    # Resident fast path: keep both tables in VMEM for the whole grid and
    # gather with in-VMEM dynamic indexing (no DMA descriptors).  Restricted to
    # 32-bit tables and sizes that fit every generation's VMEM with headroom.
    use_resident = ((not force_gather_path)
                    and itemsize == 4
                    and table_bytes <= 12 * 1024 * 1024)

    # --- Batch tiling ------------------------------------------------------
    b8 = _round_up(B, 8)
    tb = max(8, min(_round_up(tile_rows, 8), b8))
    if b8 >= 16:
        # Keep >= 2 batch tiles so the "parallel" axis can feed both v7x
        # TensorCores (no effect on v5e/v6e beyond a little extra padding).
        tb = min(tb, _round_up(-(-b8 // 2), 8))
    tb = _round_up(tb, 8)
    b_pad = _round_up(B, tb)
    n_tiles = b_pad // tb
    unroll = 8                                   # tb is a multiple of 8

    # Pad index vectors with 0 (a valid row); padded outputs are sliced off.
    uidx = jnp.zeros((b_pad,), jnp.int32).at[:B].set(
        jnp.asarray(user_input, jnp.int32))
    iidx = jnp.zeros((b_pad,), jnp.int32).at[:B].set(
        jnp.asarray(item_input, jnp.int32))

    w_row = jnp.asarray(w, jnp.float32).reshape(1, D)
    b2 = jnp.asarray(b, jnp.float32).reshape(1, 1)

    if use_resident:
        table_specs = [
            pl.BlockSpec((num_users, D), lambda t, u, i: (0, 0)),   # resident
            pl.BlockSpec((num_items, D), lambda t, u, i: (0, 0)),   # resident
        ]
        scratch_shapes = [
            pltpu.VMEM((tb, D), utab.dtype),      # gathered user rows
            pltpu.VMEM((tb, D), itab.dtype),      # gathered item rows
        ]
    else:
        table_specs = [
            pl.BlockSpec(memory_space=pl.ANY),                      # HBM
            pl.BlockSpec(memory_space=pl.ANY),                      # HBM
        ]
        scratch_shapes = [
            pltpu.VMEM((tb, D), utab.dtype),
            pltpu.VMEM((tb, D), itab.dtype),
            pltpu.SemaphoreType.DMA((2,)),        # user / item gather sems
        ]

    # Explicit scoped-VMEM budget (v5e defaults to only 16 MiB).
    scratch_bytes = 2 * tb * D * itemsize
    vmem_limit = min(48 * 1024 * 1024,
                     max(32 * 1024 * 1024,
                         (2 * table_bytes if use_resident else 0)
                         + 2 * scratch_bytes + (8 << 20)))

    kernel = functools.partial(_gmf_kernel, tb, unroll, use_resident)

    out = pl.pallas_call(
        kernel,
        out_shape=jax.ShapeDtypeStruct((b_pad, 1), jnp.float32),
        grid_spec=pltpu.PrefetchScalarGridSpec(
            num_scalar_prefetch=2,               # user_input, item_input -> SMEM
            grid=(n_tiles,),
            in_specs=table_specs + [
                pl.BlockSpec((1, D), lambda t, u, i: (0, 0)),        # weight row
                pl.BlockSpec(memory_space=pltpu.MemorySpace.SMEM),   # bias scalar
            ],
            out_specs=pl.BlockSpec((tb, 1), lambda t, u, i: (t, 0)),
            scratch_shapes=scratch_shapes,
        ),
        compiler_params=pltpu.CompilerParams(
            dimension_semantics=("parallel",),   # batch tiles are independent
            vmem_limit_bytes=int(vmem_limit),
        ),
    )(uidx, iidx, utab, itab, w_row, b2)

    return out[:B]


if __name__ == "__main__":
    num_users, num_items, embed_dim = 16, 24, 32
    batch = 20

    key = jax.random.PRNGKey(0)
    k1, k2, k3, k4, k5, k6 = jax.random.split(key, 6)

    # Deterministic parameter init (nn.Embedding ~ N(0,1); nn.Linear ~ uniform).
    user_emb_table = jax.random.normal(k1, (num_users, embed_dim), jnp.float32)
    item_emb_table = jax.random.normal(k2, (num_items, embed_dim), jnp.float32)
    bound = 1.0 / float(embed_dim) ** 0.5
    w = jax.random.uniform(k3, (1, embed_dim), jnp.float32, -bound, bound)
    b = jax.random.uniform(k4, (1,), jnp.float32, -bound, bound)

    user_input = jax.random.randint(k5, (batch,), 0, num_users, jnp.int32)
    item_input = jax.random.randint(k6, (batch,), 0, num_items, jnp.int32)

    # Pure-JAX references (elementwise + reduce to stay in exact f32).
    u = jnp.take(user_emb_table, user_input, axis=0)
    it = jnp.take(item_emb_table, item_input, axis=0)
    ref = jax.nn.sigmoid(
        jnp.sum((u * it) * w.reshape(1, -1), axis=-1, keepdims=True) + b)

    u16 = jnp.take(user_emb_table.astype(jnp.bfloat16), user_input,
                   axis=0).astype(jnp.float32)
    i16 = jnp.take(item_emb_table.astype(jnp.bfloat16), item_input,
                   axis=0).astype(jnp.float32)
    ref_bf16 = jax.nn.sigmoid(
        jnp.sum((u16 * i16) * w.reshape(1, -1), axis=-1, keepdims=True) + b)

    # 1) Default: VMEM-resident tables, in-VMEM gather, >= 2 batch tiles.
    out_resident = gmf_forward(user_emb_table, item_emb_table, w, b,
                               user_input, item_input)
    # 2) Forced HBM-gather path: per-row DMAs, unrolled issue, aggregate wait.
    out_gather = gmf_forward(user_emb_table, item_emb_table, w, b,
                             user_input, item_input,
                             tile_rows=8, force_gather_path=True)
    # 3) bf16 tables (auto-selects the HBM-gather path; halves DMA bytes).
    out_bf16 = gmf_forward(user_emb_table, item_emb_table, w, b,
                           user_input, item_input, table_dtype=jnp.bfloat16)
    jax.block_until_ready((out_resident, out_gather, out_bf16))

    assert out_resident.shape == (batch, 1)
    assert out_gather.shape == (batch, 1)
    assert out_bf16.shape == (batch, 1)
    assert jnp.allclose(out_resident, ref, atol=1e-5), "mismatch (resident path)"
    assert jnp.allclose(out_gather, ref, atol=1e-5), "mismatch (gather path)"
    assert jnp.allclose(out_bf16, ref_bf16, atol=1e-5), "mismatch (bf16 path)"

    print("KERNEL_OK")
</pallas_src>

<mosaic_0001>
module attributes {stable_mosaic.version = 11 : i64} {
  func.func @_gmf_kernel(%arg0: i32, %arg1: memref<32xi32, #tpu.memory_space<smem>>, %arg2: memref<32xi32, #tpu.memory_space<smem>>, %arg3: memref<16x32xf32, #tpu.memory_space<vmem>>, %arg4: memref<24x32xf32, #tpu.memory_space<vmem>>, %arg5: memref<1x32xf32, #tpu.memory_space<vmem>>, %arg6: memref<1x1xf32, #tpu.memory_space<smem>>, %arg7: memref<16x1xf32, #tpu.memory_space<vmem>>, %arg8: memref<16x32xf32, #tpu.memory_space<vmem>>, %arg9: memref<16x32xf32, #tpu.memory_space<vmem>>) attributes {dimension_semantics = [#tpu.dimension_semantics<parallel>], iteration_bounds = array<i64: 2>, scalar_prefetch = 2 : i64, scratch_operands = 2 : i64, tpu.core_type = #tpu.core_type<tc>, window_params = [{pipeline_mode = #tpu.pipeline_mode<synchronous>, transform_indices = @transform_0, window_bounds = array<i64: 16, 32>}, {pipeline_mode = #tpu.pipeline_mode<synchronous>, transform_indices = @transform_1, window_bounds = array<i64: 24, 32>}, {pipeline_mode = #tpu.pipeline_mode<synchronous>, transform_indices = @transform_2, window_bounds = array<i64: 1, 32>}, {transform_indices = @transform_3, window_bounds = array<i64: 1, 1>}, {transform_indices = @transform_4, window_bounds = array<i64: 16, 1>}]} {
    %c16_i32 = arith.constant 16 : i32
    %0 = arith.muli %arg0, %c16_i32 : i32
    %c0_i32 = arith.constant 0 : i32
    %c2_i32 = arith.constant 2 : i32
    %1 = arith.addi %c0_i32, %c2_i32 : i32
    %c1_i32 = arith.constant 1 : i32
    scf.for %arg10 = %c0_i32 to %1 step %c1_i32  : i32 {
      %c8_i32 = arith.constant 8 : i32
      %19 = arith.muli %arg10, %c8_i32 : i32
      %c0_i32_11 = arith.constant 0 : i32
      %20 = arith.addi %19, %c0_i32_11 : i32
      %21 = arith.addi %0, %20 : i32
      %22 = arith.index_cast %21 : i32 to index
      %23 = memref.load %arg1[%22] : memref<32xi32, #tpu.memory_space<smem>>
      %24 = arith.addi %0, %20 : i32
      %25 = arith.index_cast %24 : i32 to index
      %26 = memref.load %arg2[%25] : memref<32xi32, #tpu.memory_space<smem>>
      %27 = arith.index_cast %23 : i32 to index
      %c0_12 = arith.constant 0 : index
      %28 = vector.load %arg3[%27, %c0_12] : memref<16x32xf32, #tpu.memory_space<vmem>>, vector<1x32xf32>
      %29 = arith.index_cast %20 : i32 to index
      %c0_13 = arith.constant 0 : index
      %30 = vector.load %arg8[%29, %c0_13] : memref<16x32xf32, #tpu.memory_space<vmem>>, vector<1x32xf32>
      tpu.vector_store %arg8[%29, %c0_13], %28 {strides = array<i32>} : memref<16x32xf32, #tpu.memory_space<vmem>>, vector<1x32xf32>,
      %31 = arith.index_cast %26 : i32 to index
      %c0_14 = arith.constant 0 : index
      %32 = vector.load %arg4[%31, %c0_14] : memref<24x32xf32, #tpu.memory_space<vmem>>, vector<1x32xf32>
      %33 = arith.index_cast %20 : i32 to index
      %c0_15 = arith.constant 0 : index
      %34 = vector.load %arg9[%33, %c0_15] : memref<16x32xf32, #tpu.memory_space<vmem>>, vector<1x32xf32>
      tpu.vector_store %arg9[%33, %c0_15], %32 {strides = array<i32>} : memref<16x32xf32, #tpu.memory_space<vmem>>, vector<1x32xf32>,
      %c1_i32_16 = arith.constant 1 : i32
      %35 = arith.addi %19, %c1_i32_16 : i32
      %36 = arith.addi %0, %35 : i32
      %37 = arith.index_cast %36 : i32 to index
      %38 = memref.load %arg1[%37] : memref<32xi32, #tpu.memory_space<smem>>
      %39 = arith.addi %0, %35 : i32
      %40 = arith.index_cast %39 : i32 to index
      %41 = memref.load %arg2[%40] : memref<32xi32, #tpu.memory_space<smem>>
      %42 = arith.index_cast %38 : i32 to index
      %c0_17 = arith.constant 0 : index
      %43 = vector.load %arg3[%42, %c0_17] : memref<16x32xf32, #tpu.memory_space<vmem>>, vector<1x32xf32>
      %44 = arith.index_cast %35 : i32 to index
      %c0_18 = arith.constant 0 : index
      %45 = vector.load %arg8[%44, %c0_18] : memref<16x32xf32, #tpu.memory_space<vmem>>, vector<1x32xf32>
      tpu.vector_store %arg8[%44, %c0_18], %43 {strides = array<i32>} : memref<16x32xf32, #tpu.memory_space<vmem>>, vector<1x32xf32>,
      %46 = arith.index_cast %41 : i32 to index
      %c0_19 = arith.constant 0 : index
      %47 = vector.load %arg4[%46, %c0_19] : memref<24x32xf32, #tpu.memory_space<vmem>>, vector<1x32xf32>
      %48 = arith.index_cast %35 : i32 to index
      %c0_20 = arith.constant 0 : index
      %49 = vector.load %arg9[%48, %c0_20] : memref<16x32xf32, #tpu.memory_space<vmem>>, vector<1x32xf32>
      tpu.vector_store %arg9[%48, %c0_20], %47 {strides = array<i32>} : memref<16x32xf32, #tpu.memory_space<vmem>>, vector<1x32xf32>,
      %c2_i32_21 = arith.constant 2 : i32
      %50 = arith.addi %19, %c2_i32_21 : i32
      %51 = arith.addi %0, %50 : i32
      %52 = arith.index_cast %51 : i32 to index
      %53 = memref.load %arg1[%52] : memref<32xi32, #tpu.memory_space<smem>>
      %54 = arith.addi %0, %50 : i32
      %55 = arith.index_cast %54 : i32 to index
      %56 = memref.load %arg2[%55] : memref<32xi32, #tpu.memory_space<smem>>
      %57 = arith.index_cast %53 : i32 to index
      %c0_22 = arith.constant 0 : index
      %58 = vector.load %arg3[%57, %c0_22] : memref<16x32xf32, #tpu.memory_space<vmem>>, vector<1x32xf32>
      %59 = arith.index_cast %50 : i32 to index
      %c0_23 = arith.constant 0 : index
      %60 = vector.load %arg8[%59, %c0_23] : memref<16x32xf32, #tpu.memory_space<vmem>>, vector<1x32xf32>
      tpu.vector_store %arg8[%59, %c0_23], %58 {strides = array<i32>} : memref<16x32xf32, #tpu.memory_space<vmem>>, vector<1x32xf32>,
      %61 = arith.index_cast %56 : i32 to index
      %c0_24 = arith.constant 0 : index
      %62 = vector.load %arg4[%61, %c0_24] : memref<24x32xf32, #tpu.memory_space<vmem>>, vector<1x32xf32>
      %63 = arith.index_cast %50 : i32 to index
      %c0_25 = arith.constant 0 : index
      %64 = vector.load %arg9[%63, %c0_25] : memref<16x32xf32, #tpu.memory_space<vmem>>, vector<1x32xf32>
      tpu.vector_store %arg9[%63, %c0_25], %62 {strides = array<i32>} : memref<16x32xf32, #tpu.memory_space<vmem>>, vector<1x32xf32>,
      %c3_i32 = arith.constant 3 : i32
      %65 = arith.addi %19, %c3_i32 : i32
      %66 = arith.addi %0, %65 : i32
      %67 = arith.index_cast %66 : i32 to index
      %68 = memref.load %arg1[%67] : memref<32xi32, #tpu.memory_space<smem>>
      %69 = arith.addi %0, %65 : i32
      %70 = arith.index_cast %69 : i32 to index
      %71 = memref.load %arg2[%70] : memref<32xi32, #tpu.memory_space<smem>>
      %72 = arith.index_cast %68 : i32 to index
      %c0_26 = arith.constant 0 : index
      %73 = vector.load %arg3[%72, %c0_26] : memref<16x32xf32, #tpu.memory_space<vmem>>, vector<1x32xf32>
      %74 = arith.index_cast %65 : i32 to index
      %c0_27 = arith.constant 0 : index
      %75 = vector.load %arg8[%74, %c0_27] : memref<16x32xf32, #tpu.memory_space<vmem>>, vector<1x32xf32>
      tpu.vector_store %arg8[%74, %c0_27], %73 {strides = array<i32>} : memref<16x32xf32, #tpu.memory_space<vmem>>, vector<1x32xf32>,
      %76 = arith.index_cast %71 : i32 to index
      %c0_28 = arith.constant 0 : index
      %77 = vector.load %arg4[%76, %c0_28] : memref<24x32xf32, #tpu.memory_space<vmem>>, vector<1x32xf32>
      %78 = arith.index_cast %65 : i32 to index
      %c0_29 = arith.constant 0 : index
      %79 = vector.load %arg9[%78, %c0_29] : memref<16x32xf32, #tpu.memory_space<vmem>>, vector<1x32xf32>
      tpu.vector_store %arg9[%78, %c0_29], %77 {strides = array<i32>} : memref<16x32xf32, #tpu.memory_space<vmem>>, vector<1x32xf32>,
      %c4_i32 = arith.constant 4 : i32
      %80 = arith.addi %19, %c4_i32 : i32
      %81 = arith.addi %0, %80 : i32
      %82 = arith.index_cast %81 : i32 to index
      %83 = memref.load %arg1[%82] : memref<32xi32, #tpu.memory_space<smem>>
      %84 = arith.addi %0, %80 : i32
      %85 = arith.index_cast %84 : i32 to index
      %86 = memref.load %arg2[%85] : memref<32xi32, #tpu.memory_space<smem>>
      %87 = arith.index_cast %83 : i32 to index
      %c0_30 = arith.constant 0 : index
      %88 = vector.load %arg3[%87, %c0_30] : memref<16x32xf32, #tpu.memory_space<vmem>>, vector<1x32xf32>
      %89 = arith.index_cast %80 : i32 to index
      %c0_31 = arith.constant 0 : index
      %90 = vector.load %arg8[%89, %c0_31] : memref<16x32xf32, #tpu.memory_space<vmem>>, vector<1x32xf32>
      tpu.vector_store %arg8[%89, %c0_31], %88 {strides = array<i32>} : memref<16x32xf32, #tpu.memory_space<vmem>>, vector<1x32xf32>,
      %91 = arith.index_cast %86 : i32 to index
      %c0_32 = arith.constant 0 : index
      %92 = vector.load %arg4[%91, %c0_32] : memref<24x32xf32, #tpu.memory_space<vmem>>, vector<1x32xf32>
      %93 = arith.index_cast %80 : i32 to index
      %c0_33 = arith.constant 0 : index
      %94 = vector.load %arg9[%93, %c0_33] : memref<16x32xf32, #tpu.memory_space<vmem>>, vector<1x32xf32>
      tpu.vector_store %arg9[%93, %c0_33], %92 {strides = array<i32>} : memref<16x32xf32, #tpu.memory_space<vmem>>, vector<1x32xf32>,
      %c5_i32 = arith.constant 5 : i32
      %95 = arith.addi %19, %c5_i32 : i32
      %96 = arith.addi %0, %95 : i32
      %97 = arith.index_cast %96 : i32 to index
      %98 = memref.load %arg1[%97] : memref<32xi32, #tpu.memory_space<smem>>
      %99 = arith.addi %0, %95 : i32
      %100 = arith.index_cast %99 : i32 to index
      %101 = memref.load %arg2[%100] : memref<32xi32, #tpu.memory_space<smem>>
      %102 = arith.index_cast %98 : i32 to index
      %c0_34 = arith.constant 0 : index
      %103 = vector.load %arg3[%102, %c0_34] : memref<16x32xf32, #tpu.memory_space<vmem>>, vector<1x32xf32>
      %104 = arith.index_cast %95 : i32 to index
      %c0_35 = arith.constant 0 : index
      %105 = vector.load %arg8[%104, %c0_35] : memref<16x32xf32, #tpu.memory_space<vmem>>, vector<1x32xf32>
      tpu.vector_store %arg8[%104, %c0_35], %103 {strides = array<i32>} : memref<16x32xf32, #tpu.memory_space<vmem>>, vector<1x32xf32>,
      %106 = arith.index_cast %101 : i32 to index
      %c0_36 = arith.constant 0 : index
      %107 = vector.load %arg4[%106, %c0_36] : memref<24x32xf32, #tpu.memory_space<vmem>>, vector<1x32xf32>
      %108 = arith.index_cast %95 : i32 to index
      %c0_37 = arith.constant 0 : index
      %109 = vector.load %arg9[%108, %c0_37] : memref<16x32xf32, #tpu.memory_space<vmem>>, vector<1x32xf32>
      tpu.vector_store %arg9[%108, %c0_37], %107 {strides = array<i32>} : memref<16x32xf32, #tpu.memory_space<vmem>>, vector<1x32xf32>,
      %c6_i32 = arith.constant 6 : i32
      %110 = arith.addi %19, %c6_i32 : i32
      %111 = arith.addi %0, %110 : i32
      %112 = arith.index_cast %111 : i32 to index
      %113 = memref.load %arg1[%112] : memref<32xi32, #tpu.memory_space<smem>>
      %114 = arith.addi %0, %110 : i32
      %115 = arith.index_cast %114 : i32 to index
      %116 = memref.load %arg2[%115] : memref<32xi32, #tpu.memory_space<smem>>
      %117 = arith.index_cast %113 : i32 to index
      %c0_38 = arith.constant 0 : index
      %118 = vector.load %arg3[%117, %c0_38] : memref<16x32xf32, #tpu.memory_space<vmem>>, vector<1x32xf32>
      %119 = arith.index_cast %110 : i32 to index
      %c0_39 = arith.constant 0 : index
      %120 = vector.load %arg8[%119, %c0_39] : memref<16x32xf32, #tpu.memory_space<vmem>>, vector<1x32xf32>
      tpu.vector_store %arg8[%119, %c0_39], %118 {strides = array<i32>} : memref<16x32xf32, #tpu.memory_space<vmem>>, vector<1x32xf32>,
      %121 = arith.index_cast %116 : i32 to index
      %c0_40 = arith.constant 0 : index
      %122 = vector.load %arg4[%121, %c0_40] : memref<24x32xf32, #tpu.memory_space<vmem>>, vector<1x32xf32>
      %123 = arith.index_cast %110 : i32 to index
      %c0_41 = arith.constant 0 : index
      %124 = vector.load %arg9[%123, %c0_41] : memref<16x32xf32, #tpu.memory_space<vmem>>, vector<1x32xf32>
      tpu.vector_store %arg9[%123, %c0_41], %122 {strides = array<i32>} : memref<16x32xf32, #tpu.memory_space<vmem>>, vector<1x32xf32>,
      %c7_i32 = arith.constant 7 : i32
      %125 = arith.addi %19, %c7_i32 : i32
      %126 = arith.addi %0, %125 : i32
      %127 = arith.index_cast %126 : i32 to index
      %128 = memref.load %arg1[%127] : memref<32xi32, #tpu.memory_space<smem>>
      %129 = arith.addi %0, %125 : i32
      %130 = arith.index_cast %129 : i32 to index
      %131 = memref.load %arg2[%130] : memref<32xi32, #tpu.memory_space<smem>>
      %132 = arith.index_cast %128 : i32 to index
      %c0_42 = arith.constant 0 : index
      %133 = vector.load %arg3[%132, %c0_42] : memref<16x32xf32, #tpu.memory_space<vmem>>, vector<1x32xf32>
      %134 = arith.index_cast %125 : i32 to index
      %c0_43 = arith.constant 0 : index
      %135 = vector.load %arg8[%134, %c0_43] : memref<16x32xf32, #tpu.memory_space<vmem>>, vector<1x32xf32>
      tpu.vector_store %arg8[%134, %c0_43], %133 {strides = array<i32>} : memref<16x32xf32, #tpu.memory_space<vmem>>, vector<1x32xf32>,
      %136 = arith.index_cast %131 : i32 to index
      %c0_44 = arith.constant 0 : index
      %137 = vector.load %arg4[%136, %c0_44] : memref<24x32xf32, #tpu.memory_space<vmem>>, vector<1x32xf32>
      %138 = arith.index_cast %125 : i32 to index
      %c0_45 = arith.constant 0 : index
      %139 = vector.load %arg9[%138, %c0_45] : memref<16x32xf32, #tpu.memory_space<vmem>>, vector<1x32xf32>
      tpu.vector_store %arg9[%138, %c0_45], %137 {strides = array<i32>} : memref<16x32xf32, #tpu.memory_space<vmem>>, vector<1x32xf32>,
    }
    %c2_i32_0 = arith.constant 2 : i32
    %c0 = arith.constant 0 : index
    %c0_1 = arith.constant 0 : index
    %2 = vector.load %arg8[%c0, %c0_1] : memref<16x32xf32, #tpu.memory_space<vmem>>, vector<16x32xf32>
    %c0_2 = arith.constant 0 : index
    %c0_3 = arith.constant 0 : index
    %3 = vector.load %arg9[%c0_2, %c0_3] : memref<16x32xf32, #tpu.memory_space<vmem>>, vector<16x32xf32>
    %4 = arith.mulf %2, %3 : vector<16x32xf32>
    %c0_4 = arith.constant 0 : index
    %c0_5 = arith.constant 0 : index
    %5 = vector.load %arg5[%c0_4, %c0_5] : memref<1x32xf32, #tpu.memory_space<vmem>>, vector<1x32xf32>
    %6 = vector.broadcast %5 : vector<1x32xf32> to vector<16x32xf32>
    %7 = arith.mulf %4, %6 : vector<16x32xf32>
    %cst = arith.constant dense<0.000000e+00> : vector<16xf32>
    %8 = vector.multi_reduction <add>, %7, %cst [1] : vector<16x32xf32> to vector<16xf32>
    %9 = vector.shape_cast %8 : vector<16xf32> to vector<16x1xf32>
    %c0_6 = arith.constant 0 : index
    %c0_7 = arith.constant 0 : index
    %10 = memref.load %arg6[%c0_6, %c0_7] : memref<1x1xf32, #tpu.memory_space<smem>>
    %11 = vector.broadcast %10 : f32 to vector<16x1xf32>
    %12 = arith.addf %9, %11 : vector<16x1xf32>
    %13 = arith.negf %12 : vector<16x1xf32>
    %14 = math.exp %13 : vector<16x1xf32>
    %cst_8 = arith.constant 1.000000e+00 : f32
    %15 = vector.broadcast %cst_8 : f32 to vector<16x1xf32>
    %16 = arith.addf %15, %14 : vector<16x1xf32>
    %17 = arith.divf %15, %16 : vector<16x1xf32>
    %c0_9 = arith.constant 0 : index
    %c0_10 = arith.constant 0 : index
    %18 = vector.load %arg7[%c0_9, %c0_10] : memref<16x1xf32, #tpu.memory_space<vmem>>, vector<16x1xf32>
    tpu.vector_store %arg7[%c0_9, %c0_10], %17 {strides = array<i32>} : memref<16x1xf32, #tpu.memory_space<vmem>>, vector<16x1xf32>,
    return
  }
  func.func @transform_0(%arg0: i32, %arg1: memref<32xi32, #tpu.memory_space<smem>>, %arg2: memref<32xi32, #tpu.memory_space<smem>>) -> (i32, i32) {
    %c0_i32 = arith.constant 0 : i32
    %c0_i32_0 = arith.constant 0 : i32
    %c0_i32_1 = arith.constant 0 : i32
    return %c0_i32, %c0_i32_0 : i32, i32
  }
  func.func @transform_1(%arg0: i32, %arg1: memref<32xi32, #tpu.memory_space<smem>>, %arg2: memref<32xi32, #tpu.memory_space<smem>>) -> (i32, i32) {
    %c0_i32 = arith.constant 0 : i32
    %c0_i32_0 = arith.constant 0 : i32
    %c0_i32_1 = arith.constant 0 : i32
    return %c0_i32, %c0_i32_0 : i32, i32
  }
  func.func @transform_2(%arg0: i32, %arg1: memref<32xi32, #tpu.memory_space<smem>>, %arg2: memref<32xi32, #tpu.memory_space<smem>>) -> (i32, i32) {
    %c0_i32 = arith.constant 0 : i32
    %c0_i32_0 = arith.constant 0 : i32
    %c0_i32_1 = arith.constant 0 : i32
    return %c0_i32, %c0_i32_0 : i32, i32
  }
  func.func @transform_3(%arg0: i32, %arg1: memref<32xi32, #tpu.memory_space<smem>>, %arg2: memref<32xi32, #tpu.memory_space<smem>>) -> (i32, i32) {
    %c0_i32 = arith.constant 0 : i32
    %c0_i32_0 = arith.constant 0 : i32
    %c0_i32_1 = arith.constant 0 : i32
    return %c0_i32, %c0_i32_0 : i32, i32
  }
  func.func @transform_4(%arg0: i32, %arg1: memref<32xi32, #tpu.memory_space<smem>>, %arg2: memref<32xi32, #tpu.memory_space<smem>>) -> (i32, i32) {
    %c0_i32 = arith.constant 0 : i32
    %c0_i32_0 = arith.constant 0 : i32
    return %arg0, %c0_i32 : i32, i32
  }
}

</mosaic_0001>

<bundles_post_ra>
// kernel: tpu_custom_call.1
= control target key start
LH: loop header
LB: loop body
LE: loop exit
PB: predicated region body
PF: predicated region fallthrough
CT: control target
= control target key end

     0   :  { %s879_s0 = inlined_call_operand.vmem [shape: s32[32], index: 0, kind: input, shape index: {}]   ;;  %s880_s2 = inlined_call_operand.hbm [shape: f32[16,32], index: 2, kind: input, shape index: {}]   ;;  %s881_s3 = inlined_call_operand.hbm [shape: f32[24,32], index: 3, kind: input, shape index: {}]   ;;  %s882_s4 = inlined_call_operand.vmem [shape: f32[1,32], index: 4, kind: input, shape index: {}]   ;;  %s883_s6 = inlined_call_operand.vmem [shape: f32[32,1], index: 6, kind: output, shape index: {}]   ;;  %s884_s1 = inlined_call_operand.vmem [shape: s32[32], index: 1, kind: input, shape index: {}]   ;;  %s885_s5 = inlined_call_operand.<no memory space> [shape: f32[1,1], index: 5, kind: input, shape index: {}]  }
   0x1   :  { %s11_s23 = sshll.u32 %s879_s0, 4  ;;  %s15_s26 = sshll.u32 %s884_s1, 4  ;;  %s12_s23 = int_to_ptr.vmem [resolvable:$true] %s11_s23  ;;  %s16_s26 = int_to_ptr.vmem [resolvable:$true] %s15_s26 }
   0x2   :  { %s594_s27 = scalar_lea.vmem %s12_s23, 16  ;;  %p599_p1 = scmp.lt.s32.totalorder %s12_s23, %s12_s23 }
   0x3   :  { %p595_p0 = scmp.ne.s32.totalorder %s12_s23, %s594_s27  ;;  %p600_p2 = scmp.lt.s32.totalorder %s594_s27, %s594_s27 }
   0x5   :  { %p601_p3 = por %p600_p2, %p599_p1 }
   0x7   :  { %p602_p4 = pnand %p601_p3, %p595_p0 }
   0x9   :  { %605 = shalt.err (!%p602_p4)  }
   0xa   :  { %s696_s28 = smov [#allocation5]   ;;  %s606_s29 = scalar_lea.vmem %s16_s26, 16 }
   0xb   :  { %14 = dma.vmem_to_smem %s12_s23, 16, %s696_s28, [#allocation4] }
   0xc   :  { %p607_p5 = scmp.ne.s32.totalorder %s16_s26, %s606_s29  ;;  %p611_p6 = scmp.lt.s32.totalorder %s16_s26, %s16_s26 }
   0xd   :  { %p612_p7 = scmp.lt.s32.totalorder %s606_s29, %s606_s29 }
   0xf   :  { %p613_p8 = por %p612_p7, %p611_p6 }
  0x11   :  { %p614_p9 = pnand %p613_p8, %p607_p5 }
  0x13   :  { %617 = shalt.err (!%p614_p9)  }
  0x14   :  { %s697_s0 = smov [#allocation6]   ;;  %19 = sst [smem:[#allocation7]] %s885_s5 }
  0x15   :  { %18 = dma.vmem_to_smem %s16_s26, 16, %s697_s0, [#allocation4] }
  0x16   :  { %678 = dma.done.wait [#allocation4], 32 }
  0x17   :  { %679 = vsyncadd [#allocation4], 4294967264 }
  0x18   :  { %21 = sfence }
  0x19   :  { %22 = vsyncpa [#allocation9], 0 }
  0x1a   :  { %23 = vsyncpa [#allocation11], 0  ;;  %s746_s7 = smov 0  }
  0x1b LB: > { %s752_s8 = sadd.s32 4294967295, %s690_s7   ;;  %p502_p10 = scmp.ge.s32.totalorder %s690_s7, 1  ;;  %s690_s7 = sphi %s746_s7, %s29_s7  }
  0x1c   : > { %p144_p11 = scmp.lt.s32.totalorder %s690_s7, 3  ;;  %s698_s5 = smov [#allocation8]  }
  0x1d   : > { %s156_s9 = sshll.u32 %s698_s5, 4  ;;  %p560_p13 = scmp.eq.s32.totalorder %s752_s8, 0  ;;  %s157_s9 = int_to_ptr.vmem [resolvable:$true] %s156_s9 }
  0x1e   : > { %p756_p12 = pnand %p502_p10, %p144_p11  ;;  %s699_s11 = smov [#allocation10]  }
  0x1f   : > { %s169_s12 = sshll.u32 %s699_s11, 4  ;;  %s629_s14 = scalar_lea.vmem %s157_s9, 256  ;;  %s170_s12 = int_to_ptr.vmem [resolvable:$true] %s169_s12 }
  0x20   : > { %p553_p0 = pneg %p756_p12  ;;  %p630_p3 = scmp.ne.s32.totalorder %s157_s9, %s629_s14 }
  0x21   : > { %p637_p6 = scmp.lt.s32.totalorder %s157_s9, %s157_s9  ;;  %p638_p7 = scmp.lt.s32.totalorder %s629_s14, %s629_s14 }
  0x22   : > { %p765_p1 = pnand %p560_p13, %p553_p0 }
  0x23   : > { %p639_p8 = por %p638_p7, %p637_p6 }
  0x24   : > { %p620_p2 = pneg %p765_p1 }
  0x26   : > { %p632_p4 = pnand %p630_p3, %p620_p2 }
  0x28   : > { %p633_p5 = pneg %p632_p4 }
  0x2a   : > { %p640_p9 = pnand %p639_p8, %p633_p5 }
  0x2c   : > { %643 = shalt.err (!%p640_p9)
}
  0x2d   : > { %s700_s15 = smov 128   ;;  %s701_s16 = smov 8  }
  0x2e   : > { %556 = dma.hbm_to_vmem [thread:$0]  (!%p765_p1), %s880_s2, 256, %s157_s9, [#allocation9], %s700_s15, %s700_s15, %s701_s16  }
  0x2f   : > { %s655_s19 = scalar_lea.vmem %s170_s12, 384  ;;  %p663_p3 = scmp.lt.s32.totalorder %s170_s12, %s170_s12 }
  0x30   : > { %p656_p10 = scmp.ne.s32.totalorder %s170_s12, %s655_s19  ;;  %p664_p4 = scmp.lt.s32.totalorder %s655_s19, %s655_s19 }
  0x32   : > { %p658_p11 = pnand %p656_p10, %p620_p2  ;;  %p665_p6 = por %p664_p4, %p663_p3 }
  0x34   : > { %p659_p0 = pneg %p658_p11 }
  0x36   : > { %p666_p5 = pnand %p665_p6, %p659_p0 }
  0x38   : > { %669 = shalt.err (!%p666_p5)
}
  0x39   : > { %559 = dma.hbm_to_vmem [thread:$0]  (!%p765_p1), %s881_s3, 384, %s170_s12, [#allocation11], %s700_s15, %s700_s15, %s701_s16  }
  0x3a   : > { %191 = sbr.rel (%p756_p12) target bundleno = 293 (0x125), region = 36 }
  0x3f   : > { %681 = dma.done.wait (%p560_p13), [#allocation9], 256  }
  0x40   : > { %683 = vsyncadd (%p560_p13), [#allocation9], 4294967040 }
  0x41   : > { %685 = dma.done.wait (%p560_p13), [#allocation11], 384  }
  0x42   : > { %687 = vsyncadd (%p560_p13), [#allocation11], 4294966912  ;;  %s508_s22 = sshll.u32 %s752_s8, 1  ;;  %s799_s23 = sshll.u32 %s752_s8, 4 }
  0x43   : > { %p217_p1 = scmp.lt.s32.totalorder %s508_s22, 3  ;;  %s806_s28 = smov 0  }
  0x45   : > { %s889_s22 = smov (!%p217_p1, %s508_s22), 3 }
  0x46   : > { %s509_s24 = sshll.u32 %s889_s22, 3 }
  0x47   : > { %s804_s27 = scalar_lea.vmem %s883_s6, %s509_s24 }
  0x48 LB: >> { %s812_s29 = sshll.u32 %s694_s28, 3  ;;  %vm236_vm0 = vcmask 253952   ;;  %s228_s28 = sadd.s32 1, %s694_s28   ;;  %s694_s28 = sphi %s806_s28, %s228_s28  }
  0x49   : >> { %s230_s0 = sadd.s32 %s812_s29, %s799_s23  ;;  %s242_s8 = sadd.s32 1, %s812_s29 }
  0x4a   : >> { %s231_s1 = sld [smem:[#allocation5 + %s230_s0]]  ;;  %s243_s5 = sadd.s32 %s799_s23, %s242_s8 }
  0x4b   : >> { %s232_s30 = sld [smem:[#allocation6 + %s230_s0]]  ;;  %s254_s9 = sadd.s32 2, %s812_s29 }
  0x4c   : >> { %s244_s10 = sld [smem:[#allocation5 + %s243_s5]]  ;;  %s255_s11 = sadd.s32 %s799_s23, %s254_s9 }
  0x4d   : >> { %s245_s12 = sld [smem:[#allocation6 + %s243_s5]]  ;;  %s266_s13 = sadd.s32 3, %s812_s29 }
  0x4e   : >> { %s256_s14 = sld [smem:[#allocation5 + %s255_s11]]  ;;  %s267_s15 = sadd.s32 %s799_s23, %s266_s13 }
  0x4f   : >> { %s257_s16 = sld [smem:[#allocation6 + %s255_s11]]  ;;  %s823_s19 = scalar_lea.vmem [#allocation2], %s812_s29 }
  0x50   : >> { %s233_s17 = scalar_lea.vmem [#allocation8], %s231_s1  ;;  %s268_s18 = sld [smem:[#allocation5 + %s267_s15]] }
  0x51   : >> { %v234_v0 = vld [vmem:[%s233_s17] sm:$0x1]  ;;  %s238_s20 = scalar_lea.vmem [#allocation10], %s232_s30  ;;  %s269_s21 = sld [smem:[#allocation6 + %s267_s15]] }
  0x52   : >> { %237 = vst.msk [vmem:[%s823_s19] sm:$0x1] %vm236_vm0, %v234_v0  ;;  %v239_v1 = vld [vmem:[%s238_s20] sm:$0x1]  ;;  %s278_s22 = sadd.s32 4, %s812_s29  ;;  %s829_s24 = scalar_lea.vmem [#allocation3], %s812_s29 }
  0x53   : >> { %241 = vst.msk [vmem:[%s829_s24] sm:$0x1] %vm236_vm0, %v239_v1  ;;  %s279_s25 = sadd.s32 %s799_s23, %s278_s22  ;;  %s246_s26 = scalar_lea.vmem [#allocation8], %s244_s10 }
  0x54   : >> { %v247_v2 = vld [vmem:[%s246_s26] sm:$0x1]  ;;  %s280_s0 = sld [smem:[#allocation5 + %s279_s25]]  ;;  %s250_s1 = scalar_lea.vmem [#allocation10], %s245_s12 }
  0x55   : >> { %513 = vst.msk [vmem:[%s823_s19 + $0x1] sm:$0x1] %vm236_vm0, %v247_v2  ;;  %v251_v3 = vld [vmem:[%s250_s1] sm:$0x1]  ;;  %s281_s30 = sld [smem:[#allocation6 + %s279_s25]]  ;;  %s258_s8 = scalar_lea.vmem [#allocation8], %s256_s14 }
  0x56   : >> { %515 = vst.msk [vmem:[%s829_s24 + $0x1] sm:$0x1] %vm236_vm0, %v251_v3  ;;  %v259_v4 = vld [vmem:[%s258_s8] sm:$0x1]  ;;  %s290_s5 = sadd.s32 5, %s812_s29  ;;  %s262_s9 = scalar_lea.vmem [#allocation10], %s257_s16 }
  0x57   : >> { %517 = vst.msk [vmem:[%s823_s19 + $0x2] sm:$0x1] %vm236_vm0, %v259_v4  ;;  %v263_v5 = vld [vmem:[%s262_s9] sm:$0x1]  ;;  %s291_s10 = sadd.s32 %s799_s23, %s290_s5  ;;  %s270_s11 = scalar_lea.vmem [#allocation8], %s268_s18 }
  0x58   : >> { %519 = vst.msk [vmem:[%s829_s24 + $0x2] sm:$0x1] %vm236_vm0, %v263_v5  ;;  %v271_v6 = vld [vmem:[%s270_s11] sm:$0x1]  ;;  %s292_s12 = sld [smem:[#allocation5 + %s291_s10]]  ;;  %s274_s13 = scalar_lea.vmem [#allocation10], %s269_s21 }
  0x59   : >> { %521 = vst.msk [vmem:[%s823_s19 + $0x3] sm:$0x1] %vm236_vm0, %v271_v6  ;;  %v275_v7 = vld [vmem:[%s274_s13] sm:$0x1]  ;;  %s293_s14 = sld [smem:[#allocation6 + %s291_s10]]  ;;  %s302_s15 = sadd.s32 6, %s812_s29 }
  0x5a   : >> { %523 = vst.msk [vmem:[%s829_s24 + $0x3] sm:$0x1] %vm236_vm0, %v275_v7  ;;  %s303_s16 = sadd.s32 %s799_s23, %s302_s15  ;;  %s282_s17 = scalar_lea.vmem [#allocation8], %s280_s0 }
  0x5b   : >> { %v283_v8 = vld [vmem:[%s282_s17] sm:$0x1]  ;;  %s304_s20 = sld [smem:[#allocation5 + %s303_s16]]  ;;  %s286_s18 = scalar_lea.vmem [#allocation10], %s281_s30 }
  0x5c   : >> { %525 = vst.msk [vmem:[%s823_s19 + $0x4] sm:$0x1] %vm236_vm0, %v283_v8  ;;  %v287_v9 = vld [vmem:[%s286_s18] sm:$0x1]  ;;  %s305_s22 = sld [smem:[#allocation6 + %s303_s16]]  ;;  %s314_s25 = sadd.s32 7, %s812_s29 }
  0x5d   : >> { %527 = vst.msk [vmem:[%s829_s24 + $0x4] sm:$0x1] %vm236_vm0, %v287_v9  ;;  %s315_s21 = sadd.s32 %s799_s23, %s314_s25  ;;  %p225_p12 = scmp.ge.s32.totalorder %s228_s28, 2  }
  0x5e   : >> { %s316_s26 = sld [smem:[#allocation5 + %s315_s21]]  ;;  %s294_s1 = scalar_lea.vmem [#allocation8], %s292_s12  ;;  %v540_v18 = vld [vmem:[%s882_s4] ss:$0 sm:$0xff] (%p225_p12)  ;;  %vm341_vm1 = vcmask (%p225_p12), 261120   ;;  %vm364_vm2 = vcmask (%p225_p12), 7168  }
  0x5f   : >> { %v295_v10 = vld [vmem:[%s294_s1] sm:$0x1]  ;;  %s317_s8 = sld [smem:[#allocation6 + %s315_s21]]  ;;  %s298_s0 = scalar_lea.vmem [#allocation10], %s293_s14 }
  0x60   : >> { %529 = vst.msk [vmem:[%s823_s19 + $0x5] sm:$0x1] %vm236_vm0, %v295_v10  ;;  %v299_v11 = vld [vmem:[%s298_s0] sm:$0x1] }
  0x61   : >> { %531 = vst.msk [vmem:[%s829_s24 + $0x5] sm:$0x1] %vm236_vm0, %v299_v11  ;;  %s306_s30 = scalar_lea.vmem [#allocation8], %s304_s20 }
  0x62   : >> { %v307_v12 = vld [vmem:[%s306_s30] sm:$0x1]  ;;  %s310_s29 = scalar_lea.vmem [#allocation10], %s305_s22 }
  0x63   : >> { %533 = vst.msk [vmem:[%s823_s19 + $0x6] sm:$0x1] %vm236_vm0, %v307_v12  ;;  %v311_v13 = vld [vmem:[%s310_s29] sm:$0x1]  ;;  %227 = sbr.rel (!%p225_p12) target bundleno = 72 (0x48), region = 111 }
  0x64   : >> { %535 = vst.msk [vmem:[%s829_s24 + $0x6] sm:$0x1] %vm236_vm0, %v311_v13  ;;  %s318_s5 = scalar_lea.vmem [#allocation8], %s316_s26 }
  0x65   : >> { %v319_v14 = vld [vmem:[%s318_s5] sm:$0x1]  ;;  %s322_s9 = scalar_lea.vmem [#allocation10], %s317_s8 }
  0x66   : >> { %537 = vst.msk [vmem:[%s823_s19 + $0x7] sm:$0x1] %vm236_vm0, %v319_v14  ;;  %v323_v15 = vld [vmem:[%s322_s9] sm:$0x1]  ;;  %s348_s19 = sld [smem:[#allocation7]] (%p225_p12) }
  0x67   : >> { %539 = vst.msk [vmem:[%s829_s24 + $0x7] sm:$0x1] %vm236_vm0, %v323_v15 }
  0x6c   : > { %v349_v27 = vstv %s348_s19 }
  0x6d   : > { %v326_v16 = vld [vmem:[#allocation2] sm:$0xff]  ;;  %v327_v20 = vld [vmem:[#allocation2 + $0x8] sm:$0xff] }
  0x6e   : > { %v328_v17 = vld [vmem:[#allocation3] sm:$0xff]  ;;  %v329_v21 = vld [vmem:[#allocation3 + $0x8] sm:$0xff] }
  0x6f   : > { %v330_v19 = vmul.f32 %v328_v17, %v326_v16  ;;  %v331_v22 = vmul.f32 %v329_v21, %v327_v20 }
  0x71   : > { %v339_v23 = vmul.f32 %v540_v18, %v330_v19  ;;  %v340_v24 = vmul.f32 %v540_v18, %v331_v22 }
  0x73   : > { %v342_v25 = vsel %vm341_vm1, %v339_v23, 0.0  ;;  %v345_v26 = vsel %vm341_vm1, %v340_v24, 0.0 }
  0x74   : > { %343 = vadd.xlane.f32.xlu0 %v342_v25 }
  0x78   : > { %346 = vadd.xlane.f32.xlu0 %v345_v26 }
  0xfd   : > { %v344_v28 = vpop.xlane.xlu0 %343 }
  0xfe   : > { %v350_v29 = vadd.f32 %v349_v27, %v344_v28 }
 0x100   : > { %v541_v30 = vmul.f32 -1.442695, %v350_v29 }
 0x101   : > { %v347_v31 = vpop.xlane.xlu0 %346 }
 0x102   : > { %586 = vpow2.f32 %v541_v30  ;;  %v351_v32 = vadd.f32 %v349_v27, %v347_v31 }
 0x104   : > { %v542_v33 = vmul.f32 -1.442695, %v351_v32 }
 0x106   : > { %588 = vpow2.f32 %v542_v33 }
 0x10f   : > { %v587_v34 = vpop.eup %586 }
 0x110   : > { %v358_v35 = vadd.f32 1.0, %v587_v34 }
 0x112   : > { %590 = vrcp.f32 %v358_v35 }
 0x113   : > { %v589_v36 = vpop.eup %588 }
 0x114   : > { %v359_v37 = vadd.f32 1.0, %v589_v36 }
 0x116   : > { %592 = vrcp.f32 %v359_v37 }
 0x11f   : > { %v591_v38 = vpop.eup %590 }
 0x120   : > { %365 = vst.msk [vmem:[%s804_s27] sm:$0xff] %vm364_vm2, %v591_v38 }
 0x123   : > { %v593_v39 = vpop.eup %592 }
 0x124   : > { %366 = vst.msk [vmem:[%s804_s27 + $0x8] sm:$0xff] %vm364_vm2, %v593_v39 }
 0x125 PF: > { %s29_s7 = sadd.s32 1, %s690_s7  }
 0x126   : > { %p26_p13 = scmp.ge.s32.totalorder %s29_s7, 4  }
 0x128   :  { %28 = sbr.rel (!%p26_p13) target bundleno = 27 (0x1b), region = 122 }
 0x12d   :  { %389 = vsyncpa [#allocation9], 1 }
 0x12e   :  { %391 = vsyncpa [#allocation9 + $0x1], 1 }
 0x12f   :  { %392 = vsyncpa [#allocation11], 1 }

</bundles_post_ra>
